<compile_context>
chip_gen: v6e
topology: v6e:2x2x1
jax: 0.10.0
libtpu: 0.0.40
codegen_flags: <defaults>
</compile_context>

<pallas_src>
import math

import jax
import jax.numpy as jnp
from jax import lax
from jax.experimental import pallas as pl
from jax.experimental.pallas import tpu as pltpu  # noqa: F401  (kept for TPU-specific tuning)


MATMUL_DTYPE = jnp.bfloat16   # MXU operand dtype; accumulation is always f32
MASK_VALUE = -1e30


def _mxu_dot(a, b):
    """MXU matmul: bf16 operands, f32 accumulation."""
    return jnp.dot(a.astype(MATMUL_DTYPE), b.astype(MATMUL_DTYPE),
                   preferred_element_type=jnp.float32)


def _rms(x, w, eps):
    """RMSNorm over the last dim, all f32. x: (T, D), w: (1, D)."""
    var = jnp.mean(x * x, axis=-1, keepdims=True)
    return x * lax.rsqrt(var + eps) * w


def _make_fused_kernel(T, H, nH, nKV, hd, eps):
    Q = nH * hd
    KV = nKV * hd
    group = nH // nKV
    scale = 1.0 / math.sqrt(hd)

    def kernel(embeds_ref, spec_ref, fc_w_ref, fc_b_ref,
               in_ln_ref, hid_ln_ref, post_ln_ref, final_ln_ref,
               qkv_we_ref, qkv_wh_ref,
               cos_q_ref, sin_q_ref, cos_k_ref, sin_k_ref,
               rot_q_ref, rot_k_ref, o_w_ref,
               gate_w_ref, up_w_ref, down_w_ref,
               logits_ref, aux_ref):
        # ---- fc: (T, 3H) @ (3H, H) + b   (speculative hidden states -> H) ----
        hidden = _mxu_dot(spec_ref[...], fc_w_ref[...]) + fc_b_ref[...]
        residual = hidden

        # ---- pre-attention norms; concat folded into two summed matmuls ----
        e_n = _rms(embeds_ref[...], in_ln_ref[...], eps)
        h_n = _rms(hidden, hid_ln_ref[...], eps)
        qkv = _mxu_dot(e_n, qkv_we_ref[...]) + _mxu_dot(h_n, qkv_wh_ref[...])

        q = qkv[:, :Q]
        k = qkv[:, Q:Q + KV]
        v = qkv[:, Q + KV:]

        # ---- RoPE (Neox rotate-half) as block-diagonal permutation matmul ----
        q = q * cos_q_ref[...] + _mxu_dot(q, rot_q_ref[...]) * sin_q_ref[...]
        k = k * cos_k_ref[...] + _mxu_dot(k, rot_k_ref[...]) * sin_k_ref[...]

        # ---- causal attention, all heads in this single invocation ----
        row = lax.broadcasted_iota(jnp.int32, (T, T), 0)
        col = lax.broadcasted_iota(jnp.int32, (T, T), 1)
        causal = col <= row                      # built once, reused by all heads

        head_outs = []
        for h in range(nH):
            kvh = h // group
            qh = q[:, h * hd:(h + 1) * hd]
            kh = k[:, kvh * hd:(kvh + 1) * hd]
            vh = v[:, kvh * hd:(kvh + 1) * hd]
            s = jnp.dot(qh, kh.T, preferred_element_type=jnp.float32) * scale
            s = jnp.where(causal, s, MASK_VALUE)
            m = jnp.max(s, axis=-1, keepdims=True)
            e = jnp.exp(s - m)
            denom = jnp.sum(e, axis=-1, keepdims=True)
            o = jnp.dot(e, vh, preferred_element_type=jnp.float32)      # (T, hd)
            # normalize the (T, hd) output, not the (T, T) probs; EUP reciprocal
            head_outs.append(o * pl.reciprocal(denom, approx=True))
        attn = jnp.concatenate(head_outs, axis=-1)                       # (T, nH*hd)

        attn = _mxu_dot(attn, o_w_ref[...])                              # (T, H)

        # ---- post-attention fused add + RMSNorm ----
        res2 = attn + residual
        h2 = _rms(res2, post_ln_ref[...], eps)

        # ---- SwiGLU MLP (separate gate / up weights) ----
        g_proj = _mxu_dot(h2, gate_w_ref[...])
        u_proj = _mxu_dot(h2, up_w_ref[...])
        act = g_proj * jax.nn.sigmoid(g_proj) * u_proj
        mlp = _mxu_dot(act, down_w_ref[...])                             # (T, H)

        # ---- final fused add + RMSNorm -> (to_logits, to_aux) ----
        s_final = mlp + res2
        aux_ref[...] = s_final.astype(aux_ref.dtype)
        logits_ref[...] = _rms(s_final, final_ln_ref[...], eps).astype(logits_ref.dtype)

    return kernel


# ------------------------------ plain-JAX glue ------------------------------

def _rope_tables(positions, nH, nKV, hd, theta):
    """Precompute lane-dense cos/sin tables and the rotate-half matrices."""
    half = hd // 2
    inv_freq = 1.0 / (theta ** (jnp.arange(0, hd, 2, dtype=jnp.float32) / hd))
    ang = positions.astype(jnp.float32)[:, None] * inv_freq[None, :]        # (T, half)
    cos = jnp.concatenate([jnp.cos(ang), jnp.cos(ang)], axis=-1)            # (T, hd)
    sin = jnp.concatenate([jnp.sin(ang), jnp.sin(ang)], axis=-1)
    cos_q = jnp.tile(cos, (1, nH))
    sin_q = jnp.tile(sin, (1, nH))
    cos_k = jnp.tile(cos, (1, nKV))
    sin_k = jnp.tile(sin, (1, nKV))
    # rotate_half(x) = [-x2, x1] expressed as x @ blk (block-diagonal per head)
    blk = jnp.zeros((hd, hd), jnp.float32)
    idx = jnp.arange(half)
    blk = blk.at[idx + half, idx].set(-1.0)
    blk = blk.at[idx, idx + half].set(1.0)
    rot_q = jnp.kron(jnp.eye(nH, dtype=jnp.float32), blk)                   # (Q, Q)
    rot_k = jnp.kron(jnp.eye(nKV, dtype=jnp.float32), blk)                  # (KV, KV)
    return cos_q, sin_q, cos_k, sin_k, rot_q, rot_k


class Config:
    vocab_size = 128
    hidden_size = 32
    num_attention_heads = 4
    num_key_value_heads = 2
    intermediate_size = 64
    rms_norm_eps = 1e-6
    rope_theta = 10000.0
    # no target_hidden_size -> fc is Linear(3*hidden_size, hidden_size)


def init_params(cfg, key):
    H = cfg.hidden_size
    hd = H // cfg.num_attention_heads
    q_sz = cfg.num_attention_heads * hd
    kv_sz = cfg.num_key_value_heads * hd
    I = cfg.intermediate_size
    ks = jax.random.split(key, 10)
    s = 0.02
    return {
        "embed": jax.random.normal(ks[0], (cfg.vocab_size, H), jnp.float32) * s,
        "fc_w": jax.random.normal(ks[1], (3 * H, H), jnp.float32) * s,
        "fc_b": jax.random.normal(ks[2], (H,), jnp.float32) * s,
        "input_ln": jnp.ones((H,), jnp.float32),
        "hidden_norm": jnp.ones((H,), jnp.float32),
        "post_ln": jnp.ones((H,), jnp.float32),
        "final_norm": jnp.ones((H,), jnp.float32),
        "qkv_w": jax.random.normal(ks[3], (2 * H, q_sz + 2 * kv_sz), jnp.float32) * s,
        "o_w": jax.random.normal(ks[4], (q_sz, H), jnp.float32) * s,
        "gate_w": jax.random.normal(ks[5], (H, I), jnp.float32) * s,
        "up_w": jax.random.normal(ks[6], (H, I), jnp.float32) * s,
        "down_w": jax.random.normal(ks[7], (I, H), jnp.float32) * s,
    }


def llama_eagle3_forward(params, cfg, input_ids, positions, spec_hidden_states):
    H = cfg.hidden_size
    nH = cfg.num_attention_heads
    nKV = cfg.num_key_value_heads
    hd = H // nH
    eps = cfg.rms_norm_eps
    T = int(input_ids.shape[0])

    # Embedding lookup stays in XLA glue (data-dependent gather).
    embeds = jnp.take(params["embed"], input_ids, axis=0)                   # (T, H) f32

    cos_q, sin_q, cos_k, sin_k, rot_q, rot_k = _rope_tables(
        positions, nH, nKV, hd, cfg.rope_theta)

    wdt = MATMUL_DTYPE
    # qkv_w rows [0:H] multiply rmsnorm(embeds); rows [H:2H] multiply rmsnorm(hidden).
    qkv_we = params["qkv_w"][:H].astype(wdt)
    qkv_wh = params["qkv_w"][H:].astype(wdt)

    kernel = _make_fused_kernel(T, H, nH, nKV, hd, eps)

    to_logits, to_aux = pl.pallas_call(
        kernel,
        out_shape=(jax.ShapeDtypeStruct((T, H), jnp.float32),
                   jax.ShapeDtypeStruct((T, H), jnp.float32)),
    )(
        embeds,
        spec_hidden_states,
        params["fc_w"].astype(wdt),
        params["fc_b"].reshape(1, H).astype(jnp.float32),
        params["input_ln"].reshape(1, H).astype(jnp.float32),
        params["hidden_norm"].reshape(1, H).astype(jnp.float32),
        params["post_ln"].reshape(1, H).astype(jnp.float32),
        params["final_norm"].reshape(1, H).astype(jnp.float32),
        qkv_we, qkv_wh,
        cos_q, sin_q, cos_k, sin_k,
        rot_q.astype(wdt), rot_k.astype(wdt),
        params["o_w"].astype(wdt),
        params["gate_w"].astype(wdt),
        params["up_w"].astype(wdt),
        params["down_w"].astype(wdt),
    )
    return to_logits, [to_aux]


if __name__ == "__main__":
    cfg = Config()
    T = 8
    key = jax.random.PRNGKey(0)
    k_param, k_ids, k_spec = jax.random.split(key, 3)

    params = init_params(cfg, k_param)
    input_ids = jax.random.randint(k_ids, (T,), 0, cfg.vocab_size, dtype=jnp.int32)
    positions = jnp.arange(T, dtype=jnp.int32)
    # forward_batch.spec_info.hidden_states: concatenated hidden states from 3
    # target-model layers -> (T, 3*hidden_size)
    spec_hidden_states = jax.random.normal(k_spec, (T, 3 * cfg.hidden_size), jnp.float32)

    to_logits, aux = llama_eagle3_forward(params, cfg, input_ids, positions,
                                          spec_hidden_states)
    jax.block_until_ready(to_logits)
    jax.block_until_ready(aux[0])
    assert to_logits.shape == (T, cfg.hidden_size)
    assert aux[0].shape == (T, cfg.hidden_size)
    print("KERNEL_OK")
</pallas_src>

<mosaic_0001>
module attributes {stable_mosaic.version = 11 : i64} {
  func.func @kernel(%arg0: memref<8x32xf32, #tpu.memory_space<vmem>>, %arg1: memref<8x96xf32, #tpu.memory_space<vmem>>, %arg2: memref<96x32xbf16, #tpu.memory_space<vmem>>, %arg3: memref<1x32xf32, #tpu.memory_space<vmem>>, %arg4: memref<1x32xf32, #tpu.memory_space<vmem>>, %arg5: memref<1x32xf32, #tpu.memory_space<vmem>>, %arg6: memref<1x32xf32, #tpu.memory_space<vmem>>, %arg7: memref<1x32xf32, #tpu.memory_space<vmem>>, %arg8: memref<32x64xbf16, #tpu.memory_space<vmem>>, %arg9: memref<32x64xbf16, #tpu.memory_space<vmem>>, %arg10: memref<8x32xf32, #tpu.memory_space<vmem>>, %arg11: memref<8x32xf32, #tpu.memory_space<vmem>>, %arg12: memref<8x16xf32, #tpu.memory_space<vmem>>, %arg13: memref<8x16xf32, #tpu.memory_space<vmem>>, %arg14: memref<32x32xbf16, #tpu.memory_space<vmem>>, %arg15: memref<16x16xbf16, #tpu.memory_space<vmem>>, %arg16: memref<32x32xbf16, #tpu.memory_space<vmem>>, %arg17: memref<32x64xbf16, #tpu.memory_space<vmem>>, %arg18: memref<32x64xbf16, #tpu.memory_space<vmem>>, %arg19: memref<64x32xbf16, #tpu.memory_space<vmem>>, %arg20: memref<8x32xf32, #tpu.memory_space<vmem>>, %arg21: memref<8x32xf32, #tpu.memory_space<vmem>>) attributes {dimension_semantics = [], scalar_prefetch = 0 : i64, scratch_operands = 0 : i64, tpu.core_type = #tpu.core_type<tc>} {
    %c0 = arith.constant 0 : index
    %c0_0 = arith.constant 0 : index
    %0 = vector.load %arg1[%c0, %c0_0] : memref<8x96xf32, #tpu.memory_space<vmem>>, vector<8x96xf32>
    %c0_1 = arith.constant 0 : index
    %c0_2 = arith.constant 0 : index
    %1 = vector.load %arg2[%c0_1, %c0_2] : memref<96x32xbf16, #tpu.memory_space<vmem>>, vector<96x32xbf16>
    %2 = arith.truncf %0 : vector<8x96xf32> to vector<8x96xbf16>
    %cst = arith.constant dense<0.000000e+00> : vector<8x32xf32>
    %3 = tpu.matmul %2, %1, %cst {dimension_numbers = #tpu.dot_dimension_numbers<[1], [0], [0], [1], [0, 0, 1, 1], [], []>} : vector<8x96xbf16>, vector<96x32xbf16>, vector<8x32xf32> -> vector<8x32xf32>
    %c0_3 = arith.constant 0 : index
    %c0_4 = arith.constant 0 : index
    %4 = vector.load %arg3[%c0_3, %c0_4] : memref<1x32xf32, #tpu.memory_space<vmem>>, vector<1x32xf32>
    %5 = vector.broadcast %4 : vector<1x32xf32> to vector<8x32xf32>
    %6 = arith.addf %3, %5 : vector<8x32xf32>
    %c0_5 = arith.constant 0 : index
    %c0_6 = arith.constant 0 : index
    %7 = vector.load %arg0[%c0_5, %c0_6] : memref<8x32xf32, #tpu.memory_space<vmem>>, vector<8x32xf32>
    %c0_7 = arith.constant 0 : index
    %c0_8 = arith.constant 0 : index
    %8 = vector.load %arg4[%c0_7, %c0_8] : memref<1x32xf32, #tpu.memory_space<vmem>>, vector<1x32xf32>
    %9 = arith.mulf %7, %7 : vector<8x32xf32>
    %cst_9 = arith.constant dense<0.000000e+00> : vector<8xf32>
    %10 = vector.multi_reduction <add>, %9, %cst_9 [1] : vector<8x32xf32> to vector<8xf32>
    %11 = vector.shape_cast %10 : vector<8xf32> to vector<8x1xf32>
    %cst_10 = arith.constant 3.200000e+01 : f32
    %12 = vector.broadcast %cst_10 : f32 to vector<8x1xf32>
    %13 = arith.divf %11, %12 : vector<8x1xf32>
    %cst_11 = arith.constant 9.99999997E-7 : f32
    %14 = vector.broadcast %cst_11 : f32 to vector<8x1xf32>
    %15 = arith.addf %13, %14 : vector<8x1xf32>
    %16 = math.rsqrt %15 : vector<8x1xf32>
    %17 = vector.broadcast %16 : vector<8x1xf32> to vector<8x32xf32>
    %18 = arith.mulf %7, %17 : vector<8x32xf32>
    %19 = vector.broadcast %8 : vector<1x32xf32> to vector<8x32xf32>
    %20 = arith.mulf %18, %19 : vector<8x32xf32>
    %c0_12 = arith.constant 0 : index
    %c0_13 = arith.constant 0 : index
    %21 = vector.load %arg5[%c0_12, %c0_13] : memref<1x32xf32, #tpu.memory_space<vmem>>, vector<1x32xf32>
    %22 = arith.mulf %6, %6 : vector<8x32xf32>
    %cst_14 = arith.constant dense<0.000000e+00> : vector<8xf32>
    %23 = vector.multi_reduction <add>, %22, %cst_14 [1] : vector<8x32xf32> to vector<8xf32>
    %24 = vector.shape_cast %23 : vector<8xf32> to vector<8x1xf32>
    %cst_15 = arith.constant 3.200000e+01 : f32
    %25 = vector.broadcast %cst_15 : f32 to vector<8x1xf32>
    %26 = arith.divf %24, %25 : vector<8x1xf32>
    %cst_16 = arith.constant 9.99999997E-7 : f32
    %27 = vector.broadcast %cst_16 : f32 to vector<8x1xf32>
    %28 = arith.addf %26, %27 : vector<8x1xf32>
    %29 = math.rsqrt %28 : vector<8x1xf32>
    %30 = vector.broadcast %29 : vector<8x1xf32> to vector<8x32xf32>
    %31 = arith.mulf %6, %30 : vector<8x32xf32>
    %32 = vector.broadcast %21 : vector<1x32xf32> to vector<8x32xf32>
    %33 = arith.mulf %31, %32 : vector<8x32xf32>
    %c0_17 = arith.constant 0 : index
    %c0_18 = arith.constant 0 : index
    %34 = vector.load %arg8[%c0_17, %c0_18] : memref<32x64xbf16, #tpu.memory_space<vmem>>, vector<32x64xbf16>
    %35 = arith.truncf %20 : vector<8x32xf32> to vector<8x32xbf16>
    %cst_19 = arith.constant dense<0.000000e+00> : vector<8x64xf32>
    %36 = tpu.matmul %35, %34, %cst_19 {dimension_numbers = #tpu.dot_dimension_numbers<[1], [0], [0], [1], [0, 0, 1, 1], [], []>} : vector<8x32xbf16>, vector<32x64xbf16>, vector<8x64xf32> -> vector<8x64xf32>
    %c0_20 = arith.constant 0 : index
    %c0_21 = arith.constant 0 : index
    %37 = vector.load %arg9[%c0_20, %c0_21] : memref<32x64xbf16, #tpu.memory_space<vmem>>, vector<32x64xbf16>
    %38 = arith.truncf %33 : vector<8x32xf32> to vector<8x32xbf16>
    %cst_22 = arith.constant dense<0.000000e+00> : vector<8x64xf32>
    %39 = tpu.matmul %38, %37, %cst_22 {dimension_numbers = #tpu.dot_dimension_numbers<[1], [0], [0], [1], [0, 0, 1, 1], [], []>} : vector<8x32xbf16>, vector<32x64xbf16>, vector<8x64xf32> -> vector<8x64xf32>
    %40 = arith.addf %36, %39 : vector<8x64xf32>
    %41 = vector.extract_strided_slice %40 {offsets = [0, 0], sizes = [8, 32], strides = [1, 1]} : vector<8x64xf32> to vector<8x32xf32>
    %42 = vector.extract_strided_slice %40 {offsets = [0, 32], sizes = [8, 16], strides = [1, 1]} : vector<8x64xf32> to vector<8x16xf32>
    %43 = vector.extract_strided_slice %40 {offsets = [0, 48], sizes = [8, 16], strides = [1, 1]} : vector<8x64xf32> to vector<8x16xf32>
    %c0_23 = arith.constant 0 : index
    %c0_24 = arith.constant 0 : index
    %44 = vector.load %arg10[%c0_23, %c0_24] : memref<8x32xf32, #tpu.memory_space<vmem>>, vector<8x32xf32>
    %45 = arith.mulf %41, %44 : vector<8x32xf32>
    %c0_25 = arith.constant 0 : index
    %c0_26 = arith.constant 0 : index
    %46 = vector.load %arg14[%c0_25, %c0_26] : memref<32x32xbf16, #tpu.memory_space<vmem>>, vector<32x32xbf16>
    %47 = arith.truncf %41 : vector<8x32xf32> to vector<8x32xbf16>
    %cst_27 = arith.constant dense<0.000000e+00> : vector<8x32xf32>
    %48 = tpu.matmul %47, %46, %cst_27 {dimension_numbers = #tpu.dot_dimension_numbers<[1], [0], [0], [1], [0, 0, 1, 1], [], []>} : vector<8x32xbf16>, vector<32x32xbf16>, vector<8x32xf32> -> vector<8x32xf32>
    %c0_28 = arith.constant 0 : index
    %c0_29 = arith.constant 0 : index
    %49 = vector.load %arg11[%c0_28, %c0_29] : memref<8x32xf32, #tpu.memory_space<vmem>>, vector<8x32xf32>
    %50 = arith.mulf %48, %49 : vector<8x32xf32>
    %51 = arith.addf %45, %50 : vector<8x32xf32>
    %c0_30 = arith.constant 0 : index
    %c0_31 = arith.constant 0 : index
    %52 = vector.load %arg12[%c0_30, %c0_31] : memref<8x16xf32, #tpu.memory_space<vmem>>, vector<8x16xf32>
    %53 = arith.mulf %42, %52 : vector<8x16xf32>
    %c0_32 = arith.constant 0 : index
    %c0_33 = arith.constant 0 : index
    %54 = vector.load %arg15[%c0_32, %c0_33] : memref<16x16xbf16, #tpu.memory_space<vmem>>, vector<16x16xbf16>
    %55 = arith.truncf %42 : vector<8x16xf32> to vector<8x16xbf16>
    %cst_34 = arith.constant dense<0.000000e+00> : vector<8x16xf32>
    %56 = tpu.matmul %55, %54, %cst_34 {dimension_numbers = #tpu.dot_dimension_numbers<[1], [0], [0], [1], [0, 0, 1, 1], [], []>} : vector<8x16xbf16>, vector<16x16xbf16>, vector<8x16xf32> -> vector<8x16xf32>
    %c0_35 = arith.constant 0 : index
    %c0_36 = arith.constant 0 : index
    %57 = vector.load %arg13[%c0_35, %c0_36] : memref<8x16xf32, #tpu.memory_space<vmem>>, vector<8x16xf32>
    %58 = arith.mulf %56, %57 : vector<8x16xf32>
    %59 = arith.addf %53, %58 : vector<8x16xf32>
    %60 = tpu.iota {dimensions = array<i32: 0>} : vector<8x8xi32>
    %61 = tpu.iota {dimensions = array<i32: 1>} : vector<8x8xi32>
    %62 = arith.cmpi sle, %61, %60 : vector<8x8xi32>
    %63 = vector.extract_strided_slice %51 {offsets = [0, 0], sizes = [8, 8], strides = [1, 1]} : vector<8x32xf32> to vector<8x8xf32>
    %64 = vector.extract_strided_slice %59 {offsets = [0, 0], sizes = [8, 8], strides = [1, 1]} : vector<8x16xf32> to vector<8x8xf32>
    %65 = vector.extract_strided_slice %43 {offsets = [0, 0], sizes = [8, 8], strides = [1, 1]} : vector<8x16xf32> to vector<8x8xf32>
    %66 = tpu.transpose %64, [1, 0] : vector<8x8xf32> -> vector<8x8xf32>
    %cst_37 = arith.constant dense<0.000000e+00> : vector<8x8xf32>
    %67 = tpu.matmul %63, %66, %cst_37 {dimension_numbers = #tpu.dot_dimension_numbers<[1], [0], [0], [1], [0, 0, 1, 1], [], []>} : vector<8x8xf32>, vector<8x8xf32>, vector<8x8xf32> -> vector<8x8xf32>
    %cst_38 = arith.constant 0.353553385 : f32
    %68 = vector.broadcast %cst_38 : f32 to vector<8x8xf32>
    %69 = arith.mulf %67, %68 : vector<8x8xf32>
    %cst_39 = arith.constant -1.000000e+30 : f32
    %70 = vector.broadcast %cst_39 : f32 to vector<8x8xf32>
    %71 = arith.select %62, %69, %70 : vector<8x8xi1>, vector<8x8xf32>
    %cst_40 = arith.constant dense<0xFF800000> : vector<8xf32>
    %72 = vector.multi_reduction <maximumf>, %71, %cst_40 [1] : vector<8x8xf32> to vector<8xf32>
    %73 = vector.shape_cast %72 : vector<8xf32> to vector<8x1xf32>
    %74 = vector.broadcast %73 : vector<8x1xf32> to vector<8x8xf32>
    %75 = arith.subf %71, %74 : vector<8x8xf32>
    %76 = math.exp %75 : vector<8x8xf32>
    %cst_41 = arith.constant dense<0.000000e+00> : vector<8xf32>
    %77 = vector.multi_reduction <add>, %76, %cst_41 [1] : vector<8x8xf32> to vector<8xf32>
    %78 = vector.shape_cast %77 : vector<8xf32> to vector<8x1xf32>
    %cst_42 = arith.constant dense<0.000000e+00> : vector<8x8xf32>
    %79 = tpu.matmul %76, %65, %cst_42 {dimension_numbers = #tpu.dot_dimension_numbers<[1], [0], [0], [1], [0, 0, 1, 1], [], []>} : vector<8x8xf32>, vector<8x8xf32>, vector<8x8xf32> -> vector<8x8xf32>
    %80 = tpu.reciprocal %78 {approx = true} : vector<8x1xf32> -> vector<8x1xf32>
    %81 = vector.broadcast %80 : vector<8x1xf32> to vector<8x8xf32>
    %82 = arith.mulf %79, %81 : vector<8x8xf32>
    %83 = vector.extract_strided_slice %51 {offsets = [0, 8], sizes = [8, 8], strides = [1, 1]} : vector<8x32xf32> to vector<8x8xf32>
    %84 = vector.extract_strided_slice %59 {offsets = [0, 0], sizes = [8, 8], strides = [1, 1]} : vector<8x16xf32> to vector<8x8xf32>
    %85 = vector.extract_strided_slice %43 {offsets = [0, 0], sizes = [8, 8], strides = [1, 1]} : vector<8x16xf32> to vector<8x8xf32>
    %86 = tpu.transpose %84, [1, 0] : vector<8x8xf32> -> vector<8x8xf32>
    %cst_43 = arith.constant dense<0.000000e+00> : vector<8x8xf32>
    %87 = tpu.matmul %83, %86, %cst_43 {dimension_numbers = #tpu.dot_dimension_numbers<[1], [0], [0], [1], [0, 0, 1, 1], [], []>} : vector<8x8xf32>, vector<8x8xf32>, vector<8x8xf32> -> vector<8x8xf32>
    %cst_44 = arith.constant 0.353553385 : f32
    %88 = vector.broadcast %cst_44 : f32 to vector<8x8xf32>
    %89 = arith.mulf %87, %88 : vector<8x8xf32>
    %cst_45 = arith.constant -1.000000e+30 : f32
    %90 = vector.broadcast %cst_45 : f32 to vector<8x8xf32>
    %91 = arith.select %62, %89, %90 : vector<8x8xi1>, vector<8x8xf32>
    %cst_46 = arith.constant dense<0xFF800000> : vector<8xf32>
    %92 = vector.multi_reduction <maximumf>, %91, %cst_46 [1] : vector<8x8xf32> to vector<8xf32>
    %93 = vector.shape_cast %92 : vector<8xf32> to vector<8x1xf32>
    %94 = vector.broadcast %93 : vector<8x1xf32> to vector<8x8xf32>
    %95 = arith.subf %91, %94 : vector<8x8xf32>
    %96 = math.exp %95 : vector<8x8xf32>
    %cst_47 = arith.constant dense<0.000000e+00> : vector<8xf32>
    %97 = vector.multi_reduction <add>, %96, %cst_47 [1] : vector<8x8xf32> to vector<8xf32>
    %98 = vector.shape_cast %97 : vector<8xf32> to vector<8x1xf32>
    %cst_48 = arith.constant dense<0.000000e+00> : vector<8x8xf32>
    %99 = tpu.matmul %96, %85, %cst_48 {dimension_numbers = #tpu.dot_dimension_numbers<[1], [0], [0], [1], [0, 0, 1, 1], [], []>} : vector<8x8xf32>, vector<8x8xf32>, vector<8x8xf32> -> vector<8x8xf32>
    %100 = tpu.reciprocal %98 {approx = true} : vector<8x1xf32> -> vector<8x1xf32>
    %101 = vector.broadcast %100 : vector<8x1xf32> to vector<8x8xf32>
    %102 = arith.mulf %99, %101 : vector<8x8xf32>
    %103 = vector.extract_strided_slice %51 {offsets = [0, 16], sizes = [8, 8], strides = [1, 1]} : vector<8x32xf32> to vector<8x8xf32>
    %104 = vector.extract_strided_slice %59 {offsets = [0, 8], sizes = [8, 8], strides = [1, 1]} : vector<8x16xf32> to vector<8x8xf32>
    %105 = vector.extract_strided_slice %43 {offsets = [0, 8], sizes = [8, 8], strides = [1, 1]} : vector<8x16xf32> to vector<8x8xf32>
    %106 = tpu.transpose %104, [1, 0] : vector<8x8xf32> -> vector<8x8xf32>
    %cst_49 = arith.constant dense<0.000000e+00> : vector<8x8xf32>
    %107 = tpu.matmul %103, %106, %cst_49 {dimension_numbers = #tpu.dot_dimension_numbers<[1], [0], [0], [1], [0, 0, 1, 1], [], []>} : vector<8x8xf32>, vector<8x8xf32>, vector<8x8xf32> -> vector<8x8xf32>
    %cst_50 = arith.constant 0.353553385 : f32
    %108 = vector.broadcast %cst_50 : f32 to vector<8x8xf32>
    %109 = arith.mulf %107, %108 : vector<8x8xf32>
    %cst_51 = arith.constant -1.000000e+30 : f32
    %110 = vector.broadcast %cst_51 : f32 to vector<8x8xf32>
    %111 = arith.select %62, %109, %110 : vector<8x8xi1>, vector<8x8xf32>
    %cst_52 = arith.constant dense<0xFF800000> : vector<8xf32>
    %112 = vector.multi_reduction <maximumf>, %111, %cst_52 [1] : vector<8x8xf32> to vector<8xf32>
    %113 = vector.shape_cast %112 : vector<8xf32> to vector<8x1xf32>
    %114 = vector.broadcast %113 : vector<8x1xf32> to vector<8x8xf32>
    %115 = arith.subf %111, %114 : vector<8x8xf32>
    %116 = math.exp %115 : vector<8x8xf32>
    %cst_53 = arith.constant dense<0.000000e+00> : vector<8xf32>
    %117 = vector.multi_reduction <add>, %116, %cst_53 [1] : vector<8x8xf32> to vector<8xf32>
    %118 = vector.shape_cast %117 : vector<8xf32> to vector<8x1xf32>
    %cst_54 = arith.constant dense<0.000000e+00> : vector<8x8xf32>
    %119 = tpu.matmul %116, %105, %cst_54 {dimension_numbers = #tpu.dot_dimension_numbers<[1], [0], [0], [1], [0, 0, 1, 1], [], []>} : vector<8x8xf32>, vector<8x8xf32>, vector<8x8xf32> -> vector<8x8xf32>
    %120 = tpu.reciprocal %118 {approx = true} : vector<8x1xf32> -> vector<8x1xf32>
    %121 = vector.broadcast %120 : vector<8x1xf32> to vector<8x8xf32>
    %122 = arith.mulf %119, %121 : vector<8x8xf32>
    %123 = vector.extract_strided_slice %51 {offsets = [0, 24], sizes = [8, 8], strides = [1, 1]} : vector<8x32xf32> to vector<8x8xf32>
    %124 = vector.extract_strided_slice %59 {offsets = [0, 8], sizes = [8, 8], strides = [1, 1]} : vector<8x16xf32> to vector<8x8xf32>
    %125 = vector.extract_strided_slice %43 {offsets = [0, 8], sizes = [8, 8], strides = [1, 1]} : vector<8x16xf32> to vector<8x8xf32>
    %126 = tpu.transpose %124, [1, 0] : vector<8x8xf32> -> vector<8x8xf32>
    %cst_55 = arith.constant dense<0.000000e+00> : vector<8x8xf32>
    %127 = tpu.matmul %123, %126, %cst_55 {dimension_numbers = #tpu.dot_dimension_numbers<[1], [0], [0], [1], [0, 0, 1, 1], [], []>} : vector<8x8xf32>, vector<8x8xf32>, vector<8x8xf32> -> vector<8x8xf32>
    %cst_56 = arith.constant 0.353553385 : f32
    %128 = vector.broadcast %cst_56 : f32 to vector<8x8xf32>
    %129 = arith.mulf %127, %128 : vector<8x8xf32>
    %cst_57 = arith.constant -1.000000e+30 : f32
    %130 = vector.broadcast %cst_57 : f32 to vector<8x8xf32>
    %131 = arith.select %62, %129, %130 : vector<8x8xi1>, vector<8x8xf32>
    %cst_58 = arith.constant dense<0xFF800000> : vector<8xf32>
    %132 = vector.multi_reduction <maximumf>, %131, %cst_58 [1] : vector<8x8xf32> to vector<8xf32>
    %133 = vector.shape_cast %132 : vector<8xf32> to vector<8x1xf32>
    %134 = vector.broadcast %133 : vector<8x1xf32> to vector<8x8xf32>
    %135 = arith.subf %131, %134 : vector<8x8xf32>
    %136 = math.exp %135 : vector<8x8xf32>
    %cst_59 = arith.constant dense<0.000000e+00> : vector<8xf32>
    %137 = vector.multi_reduction <add>, %136, %cst_59 [1] : vector<8x8xf32> to vector<8xf32>
    %138 = vector.shape_cast %137 : vector<8xf32> to vector<8x1xf32>
    %cst_60 = arith.constant dense<0.000000e+00> : vector<8x8xf32>
    %139 = tpu.matmul %136, %125, %cst_60 {dimension_numbers = #tpu.dot_dimension_numbers<[1], [0], [0], [1], [0, 0, 1, 1], [], []>} : vector<8x8xf32>, vector<8x8xf32>, vector<8x8xf32> -> vector<8x8xf32>
    %140 = tpu.reciprocal %138 {approx = true} : vector<8x1xf32> -> vector<8x1xf32>
    %141 = vector.broadcast %140 : vector<8x1xf32> to vector<8x8xf32>
    %142 = arith.mulf %139, %141 : vector<8x8xf32>
    %143 = tpu.concatenate %82, %102, %122, %142 in 1 : vector<8x8xf32>, vector<8x8xf32>, vector<8x8xf32>, vector<8x8xf32> -> vector<8x32xf32>
    %c0_61 = arith.constant 0 : index
    %c0_62 = arith.constant 0 : index
    %144 = vector.load %arg16[%c0_61, %c0_62] : memref<32x32xbf16, #tpu.memory_space<vmem>>, vector<32x32xbf16>
    %145 = arith.truncf %143 : vector<8x32xf32> to vector<8x32xbf16>
    %cst_63 = arith.constant dense<0.000000e+00> : vector<8x32xf32>
    %146 = tpu.matmul %145, %144, %cst_63 {dimension_numbers = #tpu.dot_dimension_numbers<[1], [0], [0], [1], [0, 0, 1, 1], [], []>} : vector<8x32xbf16>, vector<32x32xbf16>, vector<8x32xf32> -> vector<8x32xf32>
    %147 = arith.addf %146, %6 : vector<8x32xf32>
    %c0_64 = arith.constant 0 : index
    %c0_65 = arith.constant 0 : index
    %148 = vector.load %arg6[%c0_64, %c0_65] : memref<1x32xf32, #tpu.memory_space<vmem>>, vector<1x32xf32>
    %149 = arith.mulf %147, %147 : vector<8x32xf32>
    %cst_66 = arith.constant dense<0.000000e+00> : vector<8xf32>
    %150 = vector.multi_reduction <add>, %149, %cst_66 [1] : vector<8x32xf32> to vector<8xf32>
    %151 = vector.shape_cast %150 : vector<8xf32> to vector<8x1xf32>
    %cst_67 = arith.constant 3.200000e+01 : f32
    %152 = vector.broadcast %cst_67 : f32 to vector<8x1xf32>
    %153 = arith.divf %151, %152 : vector<8x1xf32>
    %cst_68 = arith.constant 9.99999997E-7 : f32
    %154 = vector.broadcast %cst_68 : f32 to vector<8x1xf32>
    %155 = arith.addf %153, %154 : vector<8x1xf32>
    %156 = math.rsqrt %155 : vector<8x1xf32>
    %157 = vector.broadcast %156 : vector<8x1xf32> to vector<8x32xf32>
    %158 = arith.mulf %147, %157 : vector<8x32xf32>
    %159 = vector.broadcast %148 : vector<1x32xf32> to vector<8x32xf32>
    %160 = arith.mulf %158, %159 : vector<8x32xf32>
    %c0_69 = arith.constant 0 : index
    %c0_70 = arith.constant 0 : index
    %161 = vector.load %arg17[%c0_69, %c0_70] : memref<32x64xbf16, #tpu.memory_space<vmem>>, vector<32x64xbf16>
    %162 = arith.truncf %160 : vector<8x32xf32> to vector<8x32xbf16>
    %cst_71 = arith.constant dense<0.000000e+00> : vector<8x64xf32>
    %163 = tpu.matmul %162, %161, %cst_71 {dimension_numbers = #tpu.dot_dimension_numbers<[1], [0], [0], [1], [0, 0, 1, 1], [], []>} : vector<8x32xbf16>, vector<32x64xbf16>, vector<8x64xf32> -> vector<8x64xf32>
    %c0_72 = arith.constant 0 : index
    %c0_73 = arith.constant 0 : index
    %164 = vector.load %arg18[%c0_72, %c0_73] : memref<32x64xbf16, #tpu.memory_space<vmem>>, vector<32x64xbf16>
    %165 = arith.truncf %160 : vector<8x32xf32> to vector<8x32xbf16>
    %cst_74 = arith.constant dense<0.000000e+00> : vector<8x64xf32>
    %166 = tpu.matmul %165, %164, %cst_74 {dimension_numbers = #tpu.dot_dimension_numbers<[1], [0], [0], [1], [0, 0, 1, 1], [], []>} : vector<8x32xbf16>, vector<32x64xbf16>, vector<8x64xf32> -> vector<8x64xf32>
    %167 = arith.negf %163 : vector<8x64xf32>
    %168 = math.exp %167 : vector<8x64xf32>
    %cst_75 = arith.constant 1.000000e+00 : f32
    %169 = vector.broadcast %cst_75 : f32 to vector<8x64xf32>
    %170 = arith.addf %169, %168 : vector<8x64xf32>
    %171 = arith.divf %169, %170 : vector<8x64xf32>
    %172 = arith.mulf %163, %171 : vector<8x64xf32>
    %173 = arith.mulf %172, %166 : vector<8x64xf32>
    %c0_76 = arith.constant 0 : index
    %c0_77 = arith.constant 0 : index
    %174 = vector.load %arg19[%c0_76, %c0_77] : memref<64x32xbf16, #tpu.memory_space<vmem>>, vector<64x32xbf16>
    %175 = arith.truncf %173 : vector<8x64xf32> to vector<8x64xbf16>
    %cst_78 = arith.constant dense<0.000000e+00> : vector<8x32xf32>
    %176 = tpu.matmul %175, %174, %cst_78 {dimension_numbers = #tpu.dot_dimension_numbers<[1], [0], [0], [1], [0, 0, 1, 1], [], []>} : vector<8x64xbf16>, vector<64x32xbf16>, vector<8x32xf32> -> vector<8x32xf32>
    %177 = arith.addf %176, %147 : vector<8x32xf32>
    %c0_79 = arith.constant 0 : index
    %c0_80 = arith.constant 0 : index
    %178 = vector.load %arg21[%c0_79, %c0_80] : memref<8x32xf32, #tpu.memory_space<vmem>>, vector<8x32xf32>
    tpu.vector_store %arg21[%c0_79, %c0_80], %177 {strides = array<i32>} : memref<8x32xf32, #tpu.memory_space<vmem>>, vector<8x32xf32>,
    %c0_81 = arith.constant 0 : index
    %c0_82 = arith.constant 0 : index
    %179 = vector.load %arg7[%c0_81, %c0_82] : memref<1x32xf32, #tpu.memory_space<vmem>>, vector<1x32xf32>
    %180 = arith.mulf %177, %177 : vector<8x32xf32>
    %cst_83 = arith.constant dense<0.000000e+00> : vector<8xf32>
    %181 = vector.multi_reduction <add>, %180, %cst_83 [1] : vector<8x32xf32> to vector<8xf32>
    %182 = vector.shape_cast %181 : vector<8xf32> to vector<8x1xf32>
    %cst_84 = arith.constant 3.200000e+01 : f32
    %183 = vector.broadcast %cst_84 : f32 to vector<8x1xf32>
    %184 = arith.divf %182, %183 : vector<8x1xf32>
    %cst_85 = arith.constant 9.99999997E-7 : f32
    %185 = vector.broadcast %cst_85 : f32 to vector<8x1xf32>
    %186 = arith.addf %184, %185 : vector<8x1xf32>
    %187 = math.rsqrt %186 : vector<8x1xf32>
    %188 = vector.broadcast %187 : vector<8x1xf32> to vector<8x32xf32>
    %189 = arith.mulf %177, %188 : vector<8x32xf32>
    %190 = vector.broadcast %179 : vector<1x32xf32> to vector<8x32xf32>
    %191 = arith.mulf %189, %190 : vector<8x32xf32>
    %c0_86 = arith.constant 0 : index
    %c0_87 = arith.constant 0 : index
    %192 = vector.load %arg20[%c0_86, %c0_87] : memref<8x32xf32, #tpu.memory_space<vmem>>, vector<8x32xf32>
    tpu.vector_store %arg20[%c0_86, %c0_87], %191 {strides = array<i32>} : memref<8x32xf32, #tpu.memory_space<vmem>>, vector<8x32xf32>,
    return
  }
}

</mosaic_0001>

<bundles_post_ra>
// kernel: tpu_custom_call.1
= control target key start
LH: loop header
LB: loop body
LE: loop exit
PB: predicated region body
PF: predicated region fallthrough
CT: control target
= control target key end

     0   :  { %s2502_s0 = inlined_call_operand.hbm [shape: f32[8,32], index: 0, kind: input, shape index: {}]   ;;  %s2503_s1 = inlined_call_operand.hbm [shape: f32[8,96], index: 1, kind: input, shape index: {}]   ;;  %s2504_s2 = inlined_call_operand.vmem [shape: bf16[96,32], index: 2, kind: input, shape index: {}]   ;;  %s2505_s3 = inlined_call_operand.hbm [shape: f32[1,32], index: 3, kind: input, shape index: {}]   ;;  %s2506_s4 = inlined_call_operand.hbm [shape: f32[1,32], index: 4, kind: input, shape index: {}]   ;;  %s2507_s5 = inlined_call_operand.hbm [shape: f32[1,32], index: 5, kind: input, shape index: {}]   ;;  %s2508_s6 = inlined_call_operand.hbm [shape: f32[1,32], index: 6, kind: input, shape index: {}]   ;;  %s2509_s7 = inlined_call_operand.hbm [shape: f32[1,32], index: 7, kind: input, shape index: {}]   ;;  %s2510_s8 = inlined_call_operand.vmem [shape: bf16[32,64], index: 8, kind: input, shape index: {}]   ;;  %s2511_s9 = inlined_call_operand.vmem [shape: bf16[32,64], index: 9, kind: input, shape index: {}]   ;;  %s2512_s10 = inlined_call_operand.vmem [shape: f32[8,32], index: 10, kind: input, shape index: {}]   ;;  %s2513_s11 = inlined_call_operand.vmem [shape: f32[8,32], index: 11, kind: input, shape index: {}]   ;;  %s2514_s12 = inlined_call_operand.hbm [shape: f32[8,16], index: 12, kind: input, shape index: {}]   ;;  %s2515_s13 = inlined_call_operand.hbm [shape: f32[8,16], index: 13, kind: input, shape index: {}]   ;;  %s2516_s14 = inlined_call_operand.vmem [shape: bf16[32,32], index: 14, kind: input, shape index: {}]   ;;  %s2517_s15 = inlined_call_operand.hbm [shape: bf16[16,16], index: 15, kind: input, shape index: {}]   ;;  %s2518_s16 = inlined_call_operand.vmem [shape: bf16[32,32], index: 16, kind: input, shape index: {}]   ;;  %s2519_s17 = inlined_call_operand.vmem [shape: bf16[32,64], index: 17, kind: input, shape index: {}]   ;;  %s2520_s18 = inlined_call_operand.vmem [shape: bf16[32,64], index: 18, kind: input, shape index: {}]   ;;  %s2521_s19 = inlined_call_operand.vmem [shape: bf16[64,32], index: 19, kind: input, shape index: {}]   ;;  %s2522_s20 = inlined_call_operand.hbm [shape: f32[8,32], index: 20, kind: output, shape index: {0}]   ;;  %s2523_s21 = inlined_call_operand.hbm [shape: f32[8,32], index: 21, kind: output, shape index: {1}]  }
   0x1   :  { %2525 = sst [smem:[#allocation30_spill]] %s2502_s0 }
   0x2   :  { %2526 = sst [smem:[#allocation31_spill]] %s2503_s1 }
   0x3   :  { %2527 = sst [smem:[#allocation32_spill]] %s2504_s2 }
   0x4   :  { %2528 = sst [smem:[#allocation33_spill]] %s2505_s3 }
   0x5   :  { %2529 = sst [smem:[#allocation34_spill]] %s2506_s4 }
   0x6   :  { %2530 = sst [smem:[#allocation35_spill]] %s2507_s5 }
   0x7   :  { %27 = vsyncpa [#allocation3], 0 }
   0x8   :  { %28 = vsyncpa [#allocation6], 0 }
   0x9   :  { %29 = vsyncpa [#allocation9], 0 }
   0xa   :  { %30 = vsyncpa [#allocation12], 0 }
   0xb   :  { %31 = vsyncpa [#allocation15], 0 }
   0xc   :  { %32 = vsyncpa [#allocation18], 0 }
   0xd   :  { %33 = vsyncpa [#allocation4], 0 }
   0xe   :  { %34 = vsyncpa [#allocation21], 0  ;;  %s2137_s2 = smov [#allocation5]   ;;  %s2138_s26 = smov [#allocation8]  }
   0xf   :  { %s51_s25 = sshll.u32 %s2137_s2, 4  ;;  %s73_s27 = sshll.u32 %s2138_s26, 4  ;;  %s52_s25 = int_to_ptr.vmem [resolvable:$true] %s51_s25  ;;  %s74_s27 = int_to_ptr.vmem [resolvable:$true] %s73_s27 }
  0x10   :  { %s1889_s3 = scalar_lea.vmem %s52_s25, 128  ;;  %p1894_p1 = scmp.lt.s32.totalorder %s52_s25, %s52_s25 }
  0x11   :  { %p1890_p0 = scmp.ne.s32.totalorder %s52_s25, %s1889_s3  ;;  %p1895_p2 = scmp.lt.s32.totalorder %s1889_s3, %s1889_s3 }
  0x13   :  { %p1896_p3 = por %p1895_p2, %p1894_p1 }
  0x15   :  { %p1897_p4 = pnand %p1896_p3, %p1890_p0 }
  0x17   :  { %1900 = shalt.err (!%p1897_p4)
}
  0x18   :  { %s2531_s0 = sld [smem:[#allocation31_spill]]  ;;  %s1909_s4 = scalar_lea.vmem %s74_s27, 16 }
  0x19   :  { %p1910_p5 = scmp.ne.s32.totalorder %s74_s27, %s1909_s4  ;;  %s1913_s30 = scalar_lea.vmem %s74_s27, 32 }
  0x1a   :  { %p1914_p6 = scmp.lt.s32.totalorder %s74_s27, %s74_s27  ;;  %p1915_p7 = scmp.lt.s32.totalorder %s1913_s30, %s1909_s4 }
  0x1c   :  { %p1916_p8 = por %p1915_p7, %p1914_p6 }
  0x1e   :  { %54 = dma.hbm_to_vmem [thread:$0]  %s2531_s0, 128, %s52_s25, [#allocation6]  }
  0x1f   :  { %p1917_p9 = pnand %p1916_p8, %p1910_p5 }
  0x21   :  { %1920 = shalt.err (!%p1917_p9)
}
  0x22   :  { %s2532_s23 = sld [smem:[#allocation34_spill]]  ;;  %s2139_s1 = smov [#allocation11]  }
  0x23   :  { %s93_s24 = sshll.u32 %s2139_s1, 4  ;;  %s2140_s2 = smov [#allocation14]   ;;  %s94_s24 = int_to_ptr.vmem [resolvable:$true] %s93_s24 }
  0x24   :  { %s121_s26 = sshll.u32 %s2140_s2, 4  ;;  %s1929_s3 = scalar_lea.vmem %s94_s24, 16  ;;  %s122_s26 = int_to_ptr.vmem [resolvable:$true] %s121_s26 }
  0x25   :  { %p1930_p10 = scmp.ne.s32.totalorder %s94_s24, %s1929_s3  ;;  %s1933_s25 = scalar_lea.vmem %s94_s24, 32 }
  0x26   :  { %p1934_p11 = scmp.lt.s32.totalorder %s94_s24, %s94_s24  ;;  %p1935_p12 = scmp.lt.s32.totalorder %s1933_s25, %s1929_s3 }
  0x28   :  { %76 = dma.hbm_to_vmem [thread:$0]  %s2532_s23, 16, %s74_s27, [#allocation9]  }
  0x29   :  { %p1936_p13 = por %p1935_p12, %p1934_p11 }
  0x2b   :  { %p1937_p0 = pnand %p1936_p13, %p1930_p10 }
  0x2d   :  { %1940 = shalt.err (!%p1937_p0)
}
  0x2e   :  { %96 = dma.hbm_to_vmem [thread:$0]  %s2508_s6, 16, %s94_s24, [#allocation12]  }
  0x2f   :  { %s1949_s0 = scalar_lea.vmem %s122_s26, 128  ;;  %p1954_p2 = scmp.lt.s32.totalorder %s122_s26, %s122_s26 }
  0x30   :  { %p1950_p1 = scmp.ne.s32.totalorder %s122_s26, %s1949_s0  ;;  %p1955_p3 = scmp.lt.s32.totalorder %s1949_s0, %s1949_s0 }
  0x32   :  { %p1956_p4 = por %p1955_p3, %p1954_p2 }
  0x34   :  { %p1957_p5 = pnand %p1956_p4, %p1950_p1 }
  0x36   :  { %1960 = shalt.err (!%p1957_p5)
}
  0x37   :  { %124 = dma.hbm_to_vmem [thread:$0]  %s2514_s12, 128, %s122_s26, [#allocation15]  }
  0x38   :  { %s2141_s30 = smov [#allocation2]   ;;  %s2142_s22 = smov [#allocation7]  }
  0x39   :  { %s41_s5 = sshll.u32 %s2141_s30, 4  ;;  %s63_s23 = sshll.u32 %s2142_s22, 4  ;;  %s42_s5 = int_to_ptr.vmem [resolvable:$true] %s41_s5  ;;  %s64_s23 = int_to_ptr.vmem [resolvable:$true] %s63_s23 }
  0x3a   :  { %s1969_s1 = scalar_lea.vmem %s42_s5, 128  ;;  %p1974_p7 = scmp.lt.s32.totalorder %s42_s5, %s42_s5 }
  0x3b   :  { %p1970_p6 = scmp.ne.s32.totalorder %s42_s5, %s1969_s1  ;;  %p1975_p8 = scmp.lt.s32.totalorder %s1969_s1, %s1969_s1 }
  0x3d   :  { %p1976_p9 = por %p1975_p8, %p1974_p7 }
  0x3f   :  { %p1977_p10 = pnand %p1976_p9, %p1970_p6 }
  0x41   :  { %1980 = shalt.err (!%p1977_p10)
}
  0x42   :  { %s2533_s2 = sld [smem:[#allocation30_spill]]  ;;  %s1989_s3 = scalar_lea.vmem %s64_s23, 16 }
  0x43   :  { %p1990_p11 = scmp.ne.s32.totalorder %s64_s23, %s1989_s3  ;;  %s1993_s12 = scalar_lea.vmem %s64_s23, 32 }
  0x44   :  { %p1994_p12 = scmp.lt.s32.totalorder %s64_s23, %s64_s23  ;;  %p1995_p13 = scmp.lt.s32.totalorder %s1993_s12, %s1989_s3 }
  0x46   :  { %p1996_p0 = por %p1995_p13, %p1994_p12 }
  0x48   :  { %44 = dma.hbm_to_vmem [thread:$0]  %s2533_s2, 128, %s42_s5, [#allocation3]  }
  0x49   :  { %p1997_p1 = pnand %p1996_p0, %p1990_p11 }
  0x4b   :  { %2000 = shalt.err (!%p1997_p1)
}
  0x4c   :  { %s2534_s28 = sld [smem:[#allocation33_spill]]  ;;  %s2143_s29 = smov [#allocation10]  }
  0x4d   :  { %s83_s0 = sshll.u32 %s2143_s29, 4  ;;  %s2144_s27 = smov [#allocation13]   ;;  %s84_s0 = int_to_ptr.vmem [resolvable:$true] %s83_s0 }
  0x4e   :  { %s103_s4 = sshll.u32 %s2144_s27, 4  ;;  %s2009_s30 = scalar_lea.vmem %s84_s0, 16  ;;  %s104_s4 = int_to_ptr.vmem [resolvable:$true] %s103_s4 }
  0x4f   :  { %p2010_p2 = scmp.ne.s32.totalorder %s84_s0, %s2009_s30  ;;  %s2013_s5 = scalar_lea.vmem %s84_s0, 32 }
  0x50   :  { %p2014_p3 = scmp.lt.s32.totalorder %s84_s0, %s84_s0  ;;  %p2015_p4 = scmp.lt.s32.totalorder %s2013_s5, %s2009_s30 }
  0x52   :  { %66 = dma.hbm_to_vmem [thread:$0]  %s2534_s28, 16, %s64_s23, [#allocation6]  }
  0x53   :  { %p2016_p5 = por %p2015_p4, %p2014_p3 }
  0x55   :  { %p2017_p6 = pnand %p2016_p5, %p2010_p2 }
  0x57   :  { %2020 = shalt.err (!%p2017_p6)
}
  0x58   :  { %s2535_s6 = sld [smem:[#allocation35_spill]]  ;;  %s2029_s24 = scalar_lea.vmem %s104_s4, 16 }
  0x59   :  { %p2030_p7 = scmp.ne.s32.totalorder %s104_s4, %s2029_s24  ;;  %s2033_s23 = scalar_lea.vmem %s104_s4, 32 }
  0x5a   :  { %p2034_p8 = scmp.lt.s32.totalorder %s104_s4, %s104_s4  ;;  %p2035_p9 = scmp.lt.s32.totalorder %s2033_s23, %s2029_s24 }
  0x5c   :  { %p2036_p10 = por %p2035_p9, %p2034_p8 }
  0x5e   :  { %86 = dma.hbm_to_vmem [thread:$0]  %s2535_s6, 16, %s84_s0, [#allocation9]  }
  0x5f   :  { %p2037_p11 = pnand %p2036_p10, %p2030_p7 }
  0x61   :  { %2040 = shalt.err (!%p2037_p11)
}
  0x62   :  { %106 = dma.hbm_to_vmem [thread:$0]  %s2509_s7, 16, %s104_s4, [#allocation12]  }
  0x63   :  { %s2145_s12 = smov [#allocation16]   ;;  %s2146_s25 = smov [#allocation17]  }
  0x64   :  { %s131_s26 = sshll.u32 %s2145_s12, 4  ;;  %s142_s28 = sshll.u32 %s2146_s25, 4  ;;  %s132_s26 = int_to_ptr.vmem [resolvable:$true] %s131_s26  ;;  %s143_s28 = int_to_ptr.vmem [resolvable:$true] %s142_s28 }
  0x65   :  { %s2049_s29 = scalar_lea.vmem %s132_s26, 128  ;;  %p2054_p13 = scmp.lt.s32.totalorder %s132_s26, %s132_s26 }
  0x66   :  { %p2050_p12 = scmp.ne.s32.totalorder %s132_s26, %s2049_s29  ;;  %p2055_p0 = scmp.lt.s32.totalorder %s2049_s29, %s2049_s29 }
  0x68   :  { %p2056_p1 = por %p2055_p0, %p2054_p13 }
  0x6a   :  { %p2057_p2 = pnand %p2056_p1, %p2050_p12 }
  0x6c   :  { %2060 = shalt.err (!%p2057_p2)
}
  0x6d   :  { %134 = dma.hbm_to_vmem [thread:$0]  %s2515_s13, 128, %s132_s26, [#allocation15]  }
  0x6e   :  { %s2069_s30 = scalar_lea.vmem %s143_s28, 128  ;;  %p2074_p4 = scmp.lt.s32.totalorder %s143_s28, %s143_s28 }
  0x6f   :  { %p2070_p3 = scmp.ne.s32.totalorder %s143_s28, %s2069_s30  ;;  %p2075_p5 = scmp.lt.s32.totalorder %s2069_s30, %s2069_s30 }
  0x71   :  { %p2076_p6 = por %p2075_p5, %p2074_p4 }
  0x73   :  { %p2077_p7 = pnand %p2076_p6, %p2070_p3 }
  0x75   :  { %2080 = shalt.err (!%p2077_p7)
}
  0x76   :  { %s2147_s7 = smov 64   ;;  %s2148_s4 = smov 4  }
  0x77   :  { %148 = dma.hbm_to_vmem [thread:$0]  %s2517_s15, 128, %s143_s28, [#allocation18], %s2147_s7, %s2147_s7, %s2148_s4  }
  0x78   :  { %2121 = dma.done.wait [#allocation3], 128  }
  0x79   :  { %2122 = vsyncadd [#allocation3], 4294967168 }
  0x7a   :  { %2123 = dma.done.wait [#allocation6], 144  }
  0x7b   :  { %2124 = vsyncadd [#allocation6], 4294967152 }
  0x7c   :  { %2125 = dma.done.wait [#allocation9], 32  }
  0x7d   :  { %2126 = vsyncadd [#allocation9], 4294967264 }
  0x7e   :  { %2127 = dma.done.wait [#allocation12], 32  }
  0x7f   :  { %2128 = vsyncadd [#allocation12], 4294967264 }
  0x80   :  { %2129 = dma.done.wait [#allocation15], 256  }
  0x81   :  { %2130 = vsyncadd [#allocation15], 4294967040 }
  0x82   :  { %2131 = dma.done.wait [#allocation18], 128  }
  0x83   :  { %2132 = vsyncadd [#allocation18], 4294967168  ;;  %v2149_v0 = vmov 0.0   ;;  %vm2150_vm0 = vmmov 0   ;;  %s2536_s1 = sld [smem:[#allocation32_spill]]  ;;  %v188_v7 = vld [vmem:[#allocation5] sm:$0xff] }
  0x84   :  { %1681 = vmatprep.subr.bf16.mxu0 %v2149_v0  ;;  %1693 = vmatprep.mubr.msk.bf16.mxu0 %vm2150_vm0, %v2149_v0  ;;  %v201_v8 = vpack.c.bf16 %v188_v7, %v188_v7  ;;  %vm245_vm1 = vcmask 785408   ;;  %v1583_v9 = vld [vmem:[#allocation7] ss:$0 sm:$0xff]  ;;  %v289_v11 = vld [vmem:[#allocation2] sm:$0xff]  ;;  %vm292_vm2 = vcmask 261120   ;;  %v1836_v20 = vld [vmem:[%s2511_s9 + $0x8] sm:$0xff]  }
  0x85   :  { %1697 = vmatprep.subr.bf16.mxu1 %v2149_v0  ;;  %1701 = vmatprep.mubr.msk.bf16.mxu1 %vm2150_vm0, %v2149_v0  ;;  %v291_v15 = vmul.f32 %v289_v11, %v289_v11  ;;  %v1837_v21 = vld [vmem:[%s2511_s9] sm:$0xff]   ;;  %v1592_v29 = vld [vmem:[#allocation10] ss:$0 sm:$0xff]  ;;  %v1838_v33 = vld [vmem:[%s2510_s8 + $0x8] sm:$0xff]   ;;  %s2152_s6 = smov 32   ;;  %vm526_vm3 = vcmask 130048  }
  0x86   :  { %1698 = vmatpush3.bf16.msra.mxu1 %v1836_v20  ;;  %v1591_v34 = vld [vmem:[#allocation8] ss:$0 sm:$0xff]  ;;  %v1839_v38 = vld [vmem:[%s2510_s8] sm:$0xff]   ;;  %v1840_v40 = vld [vmem:[%s2516_s14 + $0x8] sm:$0xff]   ;;  %s2153_s12 = smov 120   ;;  %s2154_s26 = smov 88  }
  0x87   :  { %v293_v19 = vsel %vm292_vm2, %v291_v15, 0.0  ;;  %1699 = vmatprep.subr.bf16.mxu1 %v2149_v0  ;;  %v1841_v41 = vld [vmem:[%s2516_s14] sm:$0xff]   ;;  %v1842_v42 = vld [vmem:[#allocation17] sm:$0xff]   ;;  %s2151_s14 = smov 96   ;;  %s2155_s25 = smov 112   ;;  %vm585_vm4 = vcmask 64512  }
  0x88   :  { %v509_v53 = vld [vmem:[#allocation14] sm:$0xff]  ;;  %v570_v59 = vld [vmem:[#allocation16] sm:$0xff]  ;;  %s2158_s28 = smov 80   ;;  %s2159_s7 = smov 8   ;;  %vm1252_vm6 = vcmask 195584   ;;  %vm1487_vm7 = vcmask 523264  }
  0x89   :  { %v1830_v1 = vld [vmem:[%s2536_s1 + $0x28] sm:$0xff]   ;;  %v1831_v2 = vld [vmem:[%s2536_s1 + $0x20] sm:$0xff]   ;;  %v1832_v3 = vld [vmem:[%s2536_s1 + $0x18] sm:$0xff]   ;;  %s2160_s9 = smov 16  }
  0x8a   :  { %1682 = vmatpush3.bf16.msra.mxu0 %v1830_v1  ;;  %v1833_v4 = vld [vmem:[%s2536_s1 + $0x10] sm:$0xff]   ;;  %v1834_v5 = vld [vmem:[%s2536_s1 + $0x8] sm:$0xff]   ;;  %v1835_v6 = vld [vmem:[%s2536_s1] sm:$0xff]   ;;  %1700 = vmatpush3.bf16.msra.mxu1 %v1837_v21 }
  0x8b   :  { %1683 = vmatprep.subr.bf16.mxu0 %v2149_v0  ;;  %1705 = vmatprep.subr.bf16.mxu1 %v2149_v0 }
  0x8e   :  { %1684 = vmatpush3.bf16.msra.mxu0 %v1831_v2 }
  0x8f   :  { %1685 = vmatprep.subr.bf16.mxu0 %v2149_v0 }
  0x92   :  { %1686 = vmatpush3.bf16.msra.mxu0 %v1832_v3  ;;  %v506_v3 = vld [vmem:[%s2513_s11] sm:$0xff]  ;;  %s2156_s11 = smov 104  }
  0x93   :  { %1687 = vmatprep.subr.bf16.mxu0 %v2149_v0 }
  0x96   :  { %1688 = vmatpush3.bf16.msra.mxu0 %v1833_v4 }
  0x97   :  { %1689 = vmatprep.subr.bf16.mxu0 %v2149_v0 }
  0x9a   :  { %1690 = vmatpush3.bf16.msra.mxu0 %v1834_v5  ;;  %v444_v5 = vld [vmem:[%s2512_s10] sm:$0xff]  ;;  %s2157_s10 = smov 72  }
  0x9b   :  { %1691 = vmatprep.subr.bf16.mxu0 %v2149_v0 }
  0x9e   :  { %1692 = vmatpush3.bf16.msra.mxu0 %v1835_v6 }
  0x9f   :  { %1721 = vmatprep.subr.bf16.mxu0 %v2149_v0 }
  0xa1   :  { %1694 = vmatmul.mubr.msk.bf16.vlgmr.msra.gmra.mxu0 %vm245_vm1, %v201_v8 }
  0xa2   :  { %1723 = vmatprep.mubr.msk.bf16.mxu0 %vm2150_vm0, %v2149_v0  ;;  %1722 = vmatpush3.bf16.msra.mxu0 %v1842_v42 }
  0xa3   :  { %1727 = vmatprep.subr.mxu0 %v2149_v0 }
 0x161   :  { %v283_v10 = vpop.f32.mrf.mxu0 }
 0x162   :  { %v2336_v12 = vadd.f32 %v1583_v9, %v283_v10 }
 0x163   :  { %v1695_v13 = vpop.f32.mrf.mxu0 }
 0x164   :  { %v309_v14 = vmul.f32 %v2336_v12, %v2336_v12 }
 0x165   :  { %v286_v16 = vpop.f32.mrf.mxu0 }
 0x166   :  { %v310_v17 = vsel %vm292_vm2, %v309_v14, 0.0 }
 0x167   :  { %311 = vadd.xlane.f32.xlu0 %v310_v17  ;;  %v1696_v18 = vpop.f32.mrf.mxu0  ;;  %v577_v17 = vlaneseq }
 0x169   :  { %v578_v18 = vshrl.u32 %v577_v17, 7 }
 0x16b   :  { %294 = vadd.xlane.f32.xlu0 %v293_v19  ;;  %v580_v19 = vand.u32 127, %v577_v17 }
 0x16d   :  { %vm581_vm5 = vcmp.le.s32.totalorder %v580_v19, %v578_v18 }
 0x1f0   :  { %v312_v22 = vpop.xlane.xlu0 %311 }
 0x1f1   :  { %v313_v23 = vmul.f32 0.03125, %v312_v22 }
 0x1f3   :  { %v314_v24 = vadd.f32 1e-06, %v313_v23 }
 0x1f4   :  { %v295_v25 = vpop.xlane.xlu0 %294 }
 0x1f5   :  { %1853 = vrsqrt.f32 %v314_v24  ;;  %v297_v26 = vmul.f32 0.03125, %v295_v25 }
 0x1f7   :  { %v298_v27 = vadd.f32 1e-06, %v297_v26 }
 0x1f9   :  { %1855 = vrsqrt.f32 %v298_v27 }
 0x202   :  { %v1854_v28 = vpop.eup %1853 }
 0x203   :  { %v316_v30 = vmul.f32 %v1854_v28, %v2336_v12 }
 0x205   :  { %v323_v31 = vmul.f32 %v1592_v29, %v316_v30 }
 0x206   :  { %v1856_v32 = vpop.eup %1855 }
 0x207   :  { %v333_v35 = vpack.c.bf16 %v323_v31, %v323_v31  ;;  %v300_v36 = vmul.f32 %v1856_v32, %v289_v11 }
 0x209   :  { %1702 = vmatmul.mubr.msk.bf16.vlgmr.msra.gmra.mxu1 %vm292_vm2, %v333_v35  ;;  %v307_v37 = vmul.f32 %v1591_v34, %v300_v36 }
 0x20a   :  { %1706 = vmatpush3.bf16.msra.mxu1 %v1838_v33  ;;  %1709 = vmatprep.mubr.msk.bf16.mxu1 %vm2150_vm0, %v2149_v0 }
 0x20b   :  { %1707 = vmatprep.subr.bf16.mxu1 %v2149_v0  ;;  %v328_v39 = vpack.c.bf16 %v307_v37, %v307_v37 }
 0x20e   :  { %1708 = vmatpush3.bf16.msra.mxu1 %v1839_v38 }
 0x20f   :  { %1713 = vmatprep.subr.bf16.mxu1 %v2149_v0 }
 0x211   :  { %1710 = vmatmul.mubr.msk.bf16.vlgmr.msra.gmra.mxu1 %vm292_vm2, %v328_v39 }
 0x212   :  { %1717 = vmatprep.mubr.msk.bf16.mxu1 %vm2150_vm0, %v2149_v0  ;;  %1714 = vmatpush3.bf16.msra.mxu1 %v1840_v40 }
 0x213   :  { %1715 = vmatprep.subr.bf16.mxu1 %v2149_v0 }
 0x216   :  { %1716 = vmatpush3.bf16.msra.mxu1 %v1841_v41 }
 0x217   :  { %1732 = vmatprep.subr.mxu1 %v2149_v0 }
 0x2c9   :  { %v383_v43 = vpop.f32.mrf.mxu1 }
 0x2cb   :  { %v1703_v44 = vpop.f32.mrf.mxu1 }
 0x2cd   :  { %v386_v45 = vpop.f32.mrf.mxu1 }
 0x2cf   :  { %v1704_v46 = vpop.f32.mrf.mxu1 }
 0x2d1   :  { %v438_v47 = vpop.f32.mrf.mxu1 }
 0x2d2   :  { %v2374_v48 = vadd.f32 %v438_v47, %v383_v43 }
 0x2d3   :  { %v1711_v49 = vpop.f32.mrf.mxu1 }
 0x2d4   :  { %v450_v50 = vpack.c.bf16 %v2374_v48, %v2374_v48  ;;  %v445_v9 = vmul.f32 %v444_v5, %v2374_v48  ;;  %v1844_v5 = vld [vmem:[%s2518_s16] sm:$0xff]  }
 0x2d5   :  { %v441_v51 = vpop.f32.mrf.mxu1 }
 0x2d6   :  { %518 = vrot.lane.b32.xlu1 %v450_v50, %s2151_s14  ;;  %1718 = vmatmul.mubr.msk.bf16.vlgmr.msra.gmra.mxu1 %vm292_vm2, %v450_v50 }
 0x2d7   :  { %v1712_v52 = vpop.f32.mrf.mxu1  ;;  %1734 = vmatprep.mubr.msk.f32.mxu1 %vm2150_vm0, %v2149_v0 }
 0x2da   :  { %511 = vrot.lane.b32.xlu1 %v509_v53, %s2152_s6 }
 0x348   :  { %v519_v54 = vpop.permute.xlu1 %518 }
 0x349   :  { %1724 = vmatmul.mubr.msk.bf16.vlgmr.msra.gmra.mxu0 %vm526_vm3, %v519_v54 }
 0x34a   :  { %1729 = vmatprep.mubr.msk.f32.mxu0 %vm2150_vm0, %v2149_v0 }
 0x34c   :  { %v512_v2 = vpop.permute.xlu1 %511 }
 0x34d   :  { %v514_v4 = vmul.f32 %v512_v2, %v2374_v48  ;;  %v1843_v2 = vld [vmem:[%s2518_s16 + $0x8] sm:$0xff]   ;;  %s2161_s16 = smov 24  }
 0x396   :  { %v500_v55 = vpop.f32.mrf.mxu1 }
 0x397   :  { %v507_v7 = vmul.f32 %v506_v3, %v500_v55 }
 0x398   :  { %v1719_v56 = vpop.f32.mrf.mxu1 }
 0x399   :  { %v508_v10 = vadd.f32 %v507_v7, %v445_v9 }
 0x39a   :  { %v503_v57 = vpop.f32.mrf.mxu1 }
 0x39c   :  { %v1720_v58 = vpop.f32.mrf.mxu1 }
 0x409   :  { %v564_v60 = vpop.f32.mrf.mxu0 }
 0x40a   :  { %v571_v61 = vmul.f32 %v570_v59, %v564_v60 }
 0x40b   :  { %v1725_v62 = vpop.f32.mrf.mxu0 }
 0x40c   :  { %573 = vrot.lane.b32.xlu0 %v571_v61, %s2152_s6 }
 0x40d   :  { %v567_v63 = vpop.f32.mrf.mxu0 }
 0x40f   :  { %v1726_v1 = vpop.f32.mrf.mxu0 }
 0x47e   :  { %v574_v6 = vpop.permute.xlu0 %573 }
 0x47f   :  { %v576_v8 = vadd.f32 %v574_v6, %v514_v4 }
 0x481   :  { %583 = vrot.lane.b32.xlu1 %v576_v8, %s2151_s14 }
 0x485   :  { %751 = vrot.lane.b32.xlu1 %v508_v10, %s2153_s12 }
 0x489   :  { %913 = vrot.lane.b32.xlu1 %v576_v8, %s2154_s26 }
 0x48d   :  { %911 = vrot.lane.b32.xlu1 %v508_v10, %s2155_s25 }
 0x491   :  { %1078 = vrot.lane.b32.xlu1 %v508_v10, %s2156_s11 }
 0x4f3   :  { %v584_v11 = vpop.permute.xlu1 %583 }
 0x4f4   :  { %1728 = vmatpush3.xpose.msk.msra.mxu0 %vm585_vm4, %v584_v11 }
 0x4f5   :  { %1737 = vmatprep.subr.mxu0 %v2149_v0 }
 0x4f7   :  { %1730 = vmatmul.mubr.msk.f32.vlgmr.msra.gmra.mxu0 %vm585_vm4, %v508_v10  ;;  %v752_v13 = vpop.permute.xlu1 %751 }
 0x4f8   :  { %1738 = vmatpush3.xpose.msk.msra.mxu0 %vm585_vm4, %v584_v11  ;;  %1739 = vmatprep.mubr.msk.f32.mxu0 %vm2150_vm0, %v2149_v0 }
 0x4f9   :  { %1747 = vmatprep.subr.mxu0 %v2149_v0 }
 0x4fb   :  { %1740 = vmatmul.mubr.msk.f32.vlgmr.msra.gmra.mxu0 %vm585_vm4, %v752_v13  ;;  %v914_v14 = vpop.permute.xlu1 %913 }
 0x4fc   :  { %1748 = vmatpush3.xpose.msk.msra.mxu0 %vm585_vm4, %v914_v14  ;;  %1749 = vmatprep.mubr.msk.f32.mxu0 %vm2150_vm0, %v2149_v0 }
 0x4fd   :  { %1757 = vmatprep.subr.mxu0 %v2149_v0 }
 0x4ff   :  { %v912_v15 = vpop.permute.xlu1 %911 }
 0x500   :  { %1750 = vmatmul.mubr.msk.f32.vlgmr.msra.gmra.mxu0 %vm585_vm4, %v912_v15 }
 0x501   :  { %1758 = vmatpush3.xpose.msk.msra.mxu0 %vm585_vm4, %v914_v14  ;;  %1759 = vmatprep.mubr.msk.f32.mxu0 %vm2150_vm0, %v2149_v0 }
 0x502   :  { %1767 = vmatprep.subr.bf16.mxu0 %v2149_v0 }
 0x503   :  { %v1079_v16 = vpop.permute.xlu1 %1078 }
 0x504   :  { %1760 = vmatmul.mubr.msk.f32.vlgmr.msra.gmra.mxu0 %vm585_vm4, %v1079_v16 }
 0x505   :  { %1771 = vmatprep.mubr.msk.bf16.mxu0 %vm2150_vm0, %v2149_v0  ;;  %1768 = vmatpush3.bf16.msra.mxu0 %v1843_v2 }
 0x506   :  { %1769 = vmatprep.subr.bf16.mxu0 %v2149_v0 }
 0x509   :  { %1770 = vmatpush3.bf16.msra.mxu0 %v1844_v5 }
 0x50a   :  { %1783 = vmatprep.subr.bf16.mxu0 %v2149_v0 }
 0x5b7   :  { %v657_v20 = vpop.f32.mrf.mxu0 }
 0x5b8   :  { %v661_v21 = vmul.f32 0.35355338, %v657_v20 }
 0x5b9   :  { %v1731_v22 = vpop.f32.mrf.mxu0 }
 0x5ba   :  { %v662_v23 = vsel %vm581_vm5, %v661_v21, -1e+30 }
 0x5bb   :  { %v821_v24 = vpop.f32.mrf.mxu0  ;;  %v663_v25 = vsel %vm585_vm4, %v662_v23, -inf }
 0x5bc   :  { %v825_v26 = vmul.f32 0.35355338, %v821_v24  ;;  %664 = vmax.xlane.f32.xlu1 %v663_v25 }
 0x5bd   :  { %v1741_v27 = vpop.f32.mrf.mxu0 }
 0x5be   :  { %v826_v28 = vsel %vm581_vm5, %v825_v26, -1e+30 }
 0x5bf   :  { %v827_v29 = vsel %vm585_vm4, %v826_v28, -inf }
 0x5c0   :  { %828 = vmax.xlane.f32.xlu0 %v827_v29  ;;  %v985_v30 = vpop.f32.mrf.mxu0 }
 0x5c1   :  { %v989_v31 = vmul.f32 0.35355338, %v985_v30 }
 0x5c2   :  { %v1751_v32 = vpop.f32.mrf.mxu0 }
 0x5c3   :  { %v990_v33 = vsel %vm581_vm5, %v989_v31, -1e+30 }
 0x5c4   :  { %v1148_v34 = vpop.f32.mrf.mxu0  ;;  %v991_v35 = vsel %vm585_vm4, %v990_v33, -inf }
 0x5c5   :  { %v1152_v36 = vmul.f32 0.35355338, %v1148_v34  ;;  %992 = vmax.xlane.f32.xlu0 %v991_v35 }
 0x5c6   :  { %v1761_v37 = vpop.f32.mrf.mxu0 }
 0x5c7   :  { %v1153_v38 = vsel %vm581_vm5, %v1152_v36, -1e+30  ;;  %v1845_v36 = vld [vmem:[%s2519_s17 + $0x8] sm:$0xff]  }
 0x5c8   :  { %v1154_v39 = vsel %vm585_vm4, %v1153_v38, -inf  ;;  %v1846_v37 = vld [vmem:[%s2520_s18 + $0x8] sm:$0xff]  }
 0x5c9   :  { %1155 = vmax.xlane.f32.xlu1 %v1154_v39 }
 0x5da   :  { %1000 = vrot.lane.b32.xlu1 %v2374_v48, %s2157_s10 }
 0x5db   :  { %673 = vrot.lane.b32.xlu0 %v2374_v48, %s2158_s28 }
 0x645   :  { %v665_v40 = vpop.xlane.xlu1 %664 }
 0x646   :  { %v666_v41 = vsub.f32 %v662_v23, %v665_v40 }
 0x648   :  { %v667_v42 = vmul.f32 1.442695, %v666_v41 }
 0x649   :  { %v829_v43 = vpop.xlane.xlu0 %828 }
 0x64a   :  { %1857 = vpow2.f32 %v667_v42  ;;  %v830_v44 = vsub.f32 %v826_v28, %v829_v43  ;;  %v1619_v43 = vld [vmem:[#allocation11] ss:$0 sm:$0xff] }
 0x64c   :  { %v831_v45 = vmul.f32 1.442695, %v830_v44 }
 0x64e   :  { %1859 = vpow2.f32 %v831_v45  ;;  %v993_v46 = vpop.xlane.xlu0 %992 }
 0x64f   :  { %v994_v47 = vsub.f32 %v990_v33, %v993_v46 }
 0x651   :  { %v995_v49 = vmul.f32 1.442695, %v994_v47  ;;  %v1849_v47 = vld [vmem:[%s2521_s19 + $0x18] sm:$0xff]  }
 0x652   :  { %v674_v50 = vpop.permute.xlu0 %673  ;;  %v1156_v51 = vpop.xlane.xlu1 %1155 }
 0x653   :  { %1861 = vpow2.f32 %v995_v49  ;;  %v1157_v52 = vsub.f32 %v1153_v38, %v1156_v51  ;;  %1733 = vmatpush3.msra.mxu1 %v674_v50  ;;  %v1848_v38 = vld [vmem:[%s2520_s18] sm:$0xff]   ;;  %v1850_v49 = vld [vmem:[%s2521_s19 + $0x10] sm:$0xff]  }
 0x654   :  { %1742 = vmatprep.subr.mxu1 %v2149_v0  ;;  %v1852_v51 = vld [vmem:[%s2521_s19] sm:$0xff]  }
 0x655   :  { %v1158_v53 = vmul.f32 1.442695, %v1157_v52 }
 0x656   :  { %v1001_v55 = vpop.permute.xlu1 %1000 }
 0x657   :  { %v1858_v48 = vpop.eup %1857  ;;  %1863 = vpow2.f32 %v1158_v53 }
 0x658   :  { %1735 = vmatmul.mubr.msk.f32.vlgmr.msra.gmra.mxu1 %vm585_vm4, %v1858_v48  ;;  %v669_v58 = vsel %vm585_vm4, %v1858_v48, 0.0 }
 0x659   :  { %1743 = vmatpush3.msra.mxu1 %v674_v50  ;;  %1744 = vmatprep.mubr.msk.f32.mxu1 %vm2150_vm0, %v2149_v0  ;;  %v1851_v50 = vld [vmem:[%s2521_s19 + $0x8] sm:$0xff]   ;;  %s2162_s19 = smov [#allocation20]  }
 0x65a   :  { %1752 = vmatprep.subr.mxu1 %v2149_v0  ;;  %s1565_s26 = sshll.u32 %s2162_s19, 4  ;;  %s1566_s26 = int_to_ptr.vmem [resolvable:$true] %s1565_s26 }
 0x65b   :  { %v1860_v54 = vpop.eup %1859  ;;  %s2081_s25 = scalar_lea.vmem %s1566_s26, 128  ;;  %p2086_p9 = scmp.lt.s32.totalorder %s1566_s26, %s1566_s26 }
 0x65c   :  { %1745 = vmatmul.mubr.msk.f32.vlgmr.msra.gmra.mxu1 %vm585_vm4, %v1860_v54  ;;  %v833_v56 = vsel %vm585_vm4, %v1860_v54, 0.0  ;;  %p2082_p8 = scmp.ne.s32.totalorder %s1566_s26, %s2081_s25  ;;  %p2087_p10 = scmp.lt.s32.totalorder %s2081_s25, %s2081_s25 }
 0x65d   :  { %1753 = vmatpush3.msra.mxu1 %v1001_v55  ;;  %834 = vadd.xlane.f32.xlu1 %v833_v56 }
 0x65e   :  { %1754 = vmatprep.mubr.msk.f32.mxu1 %vm2150_vm0, %v2149_v0  ;;  %1762 = vmatprep.subr.mxu1 %v2149_v0  ;;  %p2088_p11 = por %p2087_p10, %p2086_p9 }
 0x660   :  { %v1862_v57 = vpop.eup %1861  ;;  %p2089_p12 = pnand %p2088_p11, %p2082_p8 }
 0x661   :  { %670 = vadd.xlane.f32.xlu1 %v669_v58  ;;  %1755 = vmatmul.mubr.msk.f32.vlgmr.msra.gmra.mxu1 %vm585_vm4, %v1862_v57  ;;  %v997_v59 = vsel %vm585_vm4, %v1862_v57, 0.0 }
 0x662   :  { %1763 = vmatpush3.msra.mxu1 %v1001_v55  ;;  %998 = vadd.xlane.f32.xlu0 %v997_v59 }
 0x663   :  { %1764 = vmatprep.mubr.msk.f32.mxu1 %vm2150_vm0, %v2149_v0  ;;  %1775 = vmatprep.subr.bf16.mxu1 %v2149_v0 }
 0x664   :  { %v1864_v60 = vpop.eup %1863 }
 0x665   :  { %1765 = vmatmul.mubr.msk.f32.vlgmr.msra.gmra.mxu1 %vm585_vm4, %v1864_v60  ;;  %v1160_v61 = vsel %vm585_vm4, %v1864_v60, 0.0 }
 0x666   :  { %1161 = vadd.xlane.f32.xlu0 %v1160_v61  ;;  %1779 = vmatprep.mubr.msk.bf16.mxu1 %vm2150_vm0, %v2149_v0 }
 0x667   :  { %1776 = vmatpush3.bf16.msra.mxu1 %v1845_v36 }
 0x668   :  { %1777 = vmatprep.subr.bf16.mxu1 %v2149_v0 }
 0x6e6   :  { %v835_v62 = vpop.xlane.xlu1 %834 }
 0x6e7   :  { %1865 = vrcp.f32 %v835_v62 }
 0x6ea   :  { %v671_v19 = vpop.xlane.xlu1 %670 }
 0x6eb   :  { %v999_v63 = vpop.xlane.xlu0 %998 }
 0x6ec   :  { %1867 = vrcp.f32 %v999_v63 }
 0x6ef   :  { %v1162_v1 = vpop.xlane.xlu0 %1161 }
 0x6f0   :  { %1869 = vrcp.f32 %v1162_v1 }
 0x6f1   :  { %1871 = vrcp.f32 %v671_v19 }
 0x6f4   :  { %v1866_v6 = vpop.eup %1865 }
 0x6f9   :  { %v1868_v10 = vpop.eup %1867 }
 0x6fd   :  { %v1870_v15 = vpop.eup %1869 }
 0x6fe   :  { %v1872_v20 = vpop.eup %1871 }
 0x718   :  { %v745_v3 = vpop.f32.mrf.mxu1 }
 0x719   :  { %v750_v23 = vmul.f32 %v1872_v20, %v745_v3 }
 0x71a   :  { %v1736_v4 = vpop.f32.mrf.mxu1 }
 0x71c   :  { %v905_v7 = vpop.f32.mrf.mxu1 }
 0x71d   :  { %v910_v8 = vmul.f32 %v1866_v6, %v905_v7 }
 0x71e   :  { %v1746_v9 = vpop.f32.mrf.mxu1 }
 0x71f   :  { %1239 = vrot.lane.b32.xlu0 %v910_v8, %s2159_s7 }
 0x721   :  { %v1072_v11 = vpop.f32.mrf.mxu1 }
 0x722   :  { %v1077_v13 = vmul.f32 %v1868_v10, %v1072_v11 }
 0x723   :  { %v1756_v14 = vpop.f32.mrf.mxu1 }
 0x724   :  { %1243 = vrot.lane.b32.xlu1 %v1077_v13, %s2160_s9 }
 0x725   :  { %v1232_v16 = vpop.f32.mrf.mxu1 }
 0x726   :  { %v1237_v17 = vmul.f32 %v1870_v15, %v1232_v16 }
 0x727   :  { %v1766_v18 = vpop.f32.mrf.mxu1 }
 0x728   :  { %1247 = vrot.lane.b32.xlu1 %v1237_v17, %s2161_s16 }
 0x791   :  { %v1240_v21 = vpop.permute.xlu0 %1239 }
 0x792   :  { %v1250_v24 = vsel %vm585_vm4, %v750_v23, %v1240_v21 }
 0x796   :  { %v1244_v22 = vpop.permute.xlu1 %1243 }
 0x797   :  { %v1251_v25 = vsel %vm526_vm3, %v1250_v24, %v1244_v22 }
 0x79a   :  { %v1248_v26 = vpop.permute.xlu1 %1247 }
 0x79b   :  { %v1253_v27 = vsel %vm1252_vm6, %v1251_v25, %v1248_v26 }
 0x79c   :  { %v1258_v28 = vpack.c.bf16 %v1253_v27, %v1253_v27 }
 0x79e   :  { %1772 = vmatmul.mubr.msk.bf16.vlgmr.msra.gmra.mxu0 %vm292_vm2, %v1258_v28 }
 0x79f   :  { %1787 = vmatprep.mubr.msk.bf16.mxu0 %vm2150_vm0, %v2149_v0  ;;  %1784 = vmatpush3.bf16.msra.mxu0 %v1846_v37 }
 0x7a0   :  { %1785 = vmatprep.subr.bf16.mxu0 %v2149_v0 }
 0x7a3   :  { %1786 = vmatpush3.bf16.msra.mxu0 %v1848_v38 }
 0x85e   :  { %v1308_v29 = vpop.f32.mrf.mxu0 }
 0x85f   :  { %v1309_v30 = vadd.f32 %v1308_v29, %v2336_v12  ;;  %v1847_v12 = vld [vmem:[%s2519_s17] sm:$0xff]  }
 0x860   :  { %v1773_v31 = vpop.f32.mrf.mxu0  ;;  %1778 = vmatpush3.bf16.msra.mxu1 %v1847_v12 }
 0x861   :  { %v1315_v32 = vmul.f32 %v1309_v30, %v1309_v30  ;;  %1791 = vmatprep.subr.bf16.mxu1 %v2149_v0 }
 0x862   :  { %v1311_v33 = vpop.f32.mrf.mxu0 }
 0x863   :  { %v1316_v34 = vsel %vm292_vm2, %v1315_v32, 0.0 }
 0x864   :  { %1317 = vadd.xlane.f32.xlu0 %v1316_v34  ;;  %v1774_v35 = vpop.f32.mrf.mxu0 }
 0x8ed   :  { %v1318_v39 = vpop.xlane.xlu0 %1317 }
 0x8ee   :  { %v1319_v40 = vmul.f32 0.03125, %v1318_v39 }
 0x8f0   :  { %v1320_v41 = vadd.f32 1e-06, %v1319_v40 }
 0x8f2   :  { %1873 = vrsqrt.f32 %v1320_v41 }
 0x8ff   :  { %v1874_v42 = vpop.eup %1873 }
 0x900   :  { %v1322_v44 = vmul.f32 %v1874_v42, %v1309_v30 }
 0x902   :  { %v1329_v45 = vmul.f32 %v1619_v43, %v1322_v44 }
 0x904   :  { %v1334_v46 = vpack.c.bf16 %v1329_v45, %v1329_v45 }
 0x906   :  { %1780 = vmatmul.mubr.msk.bf16.vlgmr.msra.gmra.mxu1 %vm292_vm2, %v1334_v46  ;;  %1788 = vmatmul.mubr.msk.bf16.vlgmr.msra.gmra.mxu0 %vm292_vm2, %v1334_v46 }
 0x907   :  { %1799 = vmatprep.mubr.msk.bf16.mxu1 %vm2150_vm0, %v2149_v0  ;;  %1792 = vmatpush3.bf16.msra.mxu1 %v1849_v47 }
 0x908   :  { %1793 = vmatprep.subr.bf16.mxu1 %v2149_v0 }
 0x90b   :  { %1794 = vmatpush3.bf16.msra.mxu1 %v1850_v49 }
 0x90c   :  { %1795 = vmatprep.subr.bf16.mxu1 %v2149_v0 }
 0x90f   :  { %1796 = vmatpush3.bf16.msra.mxu1 %v1851_v50 }
 0x910   :  { %1797 = vmatprep.subr.bf16.mxu1 %v2149_v0 }
 0x913   :  { %1798 = vmatpush3.bf16.msra.mxu1 %v1852_v51 }
 0x9c6   :  { %v1384_v52 = vpop.f32.mrf.mxu1  ;;  %v1440_v53 = vpop.f32.mrf.mxu0 }
 0x9c7   :  { %v1626_v48 = vmul.f32 -1.442695, %v1384_v52 }
 0x9c8   :  { %v1781_v54 = vpop.f32.mrf.mxu1  ;;  %v1789_v55 = vpop.f32.mrf.mxu0 }
 0x9c9   :  { %1875 = vpow2.f32 %v1626_v48 }
 0x9ca   :  { %v1387_v56 = vpop.f32.mrf.mxu1  ;;  %v1443_v57 = vpop.f32.mrf.mxu0 }
 0x9cc   :  { %v1782_v58 = vpop.f32.mrf.mxu1  ;;  %v1790_v59 = vpop.f32.mrf.mxu0 }
 0x9d6   :  { %v1876_v60 = vpop.eup %1875 }
 0x9d7   :  { %v1449_v61 = vadd.f32 1.0, %v1876_v60 }
 0x9d9   :  { %1877 = vrcp.f32 %v1449_v61 }
 0x9e6   :  { %v1878_v62 = vpop.eup %1877 }
 0x9e7   :  { %v1452_v0 = vmul.f32 %v1878_v62, %v1384_v52 }
 0x9e9   :  { %v1453_v63 = vmul.f32 %v1452_v0, %v1440_v53 }
 0x9eb   :  { %v1462_v1 = vpack.c.bf16 %v1453_v63, %v1453_v63 }
 0x9ed   :  { %1800 = vmatmul.mubr.msk.bf16.vlgmr.msra.gmra.mxu1 %vm1487_vm7, %v1462_v1 }
 0xaad   :  { %v1525_v2 = vpop.f32.mrf.mxu1 }
 0xaae   :  { %v1526_v3 = vadd.f32 %v1525_v2, %v1309_v30 }
 0xaaf   :  { %v1801_v4 = vpop.f32.mrf.mxu1 }
 0xab0   :  { %1531 = vst.msk [vmem:[#allocation20] sm:$0xff] %vm292_vm2, %v1526_v3  ;;  %v1533_v5 = vmul.f32 %v1526_v3, %v1526_v3 }
 0xab1   :  { %v1528_v6 = vpop.f32.mrf.mxu1 }
 0xab2   :  { %v1534_v7 = vsel %vm292_vm2, %v1533_v5, 0.0 }
 0xab3   :  { %1535 = vadd.xlane.f32.xlu1 %v1534_v7  ;;  %v1802_v8 = vpop.f32.mrf.mxu1 }
 0xab4   :  { %2092 = shalt.err (!%p2089_p12)
}
 0xab5   :  { %1568 = dma.vmem_to_hbm [thread:$0]  %s1566_s26, 128, %s2523_s21, [#allocation21]   ;;  %v1632_v14 = vld [vmem:[#allocation13] ss:$0 sm:$0xff] }
 0xab6   :  { %s2163_s28 = smov [#allocation19]  }
 0xab7   :  { %s1555_s29 = sshll.u32 %s2163_s28, 4  ;;  %s1556_s29 = int_to_ptr.vmem [resolvable:$true] %s1555_s29 }
 0xab8   :  { %s2101_s0 = scalar_lea.vmem %s1556_s29, 128  ;;  %p2106_p0 = scmp.lt.s32.totalorder %s1556_s29, %s1556_s29 }
 0xab9   :  { %p2102_p13 = scmp.ne.s32.totalorder %s1556_s29, %s2101_s0  ;;  %p2107_p1 = scmp.lt.s32.totalorder %s2101_s0, %s2101_s0 }
 0xabb   :  { %p2108_p2 = por %p2107_p1, %p2106_p0 }
 0xabd   :  { %p2109_p3 = pnand %p2108_p2, %p2102_p13 }
 0xb3c   :  { %v1536_v9 = vpop.xlane.xlu1 %1535 }
 0xb3d   :  { %v1537_v10 = vmul.f32 0.03125, %v1536_v9 }
 0xb3f   :  { %v1538_v11 = vadd.f32 1e-06, %v1537_v10 }
 0xb41   :  { %1879 = vrsqrt.f32 %v1538_v11 }
 0xb4e   :  { %v1880_v13 = vpop.eup %1879 }
 0xb4f   :  { %v1540_v15 = vmul.f32 %v1880_v13, %v1526_v3 }
 0xb51   :  { %v1547_v16 = vmul.f32 %v1632_v14, %v1540_v15 }
 0xb53   :  { %1548 = vst.msk [vmem:[#allocation19] sm:$0xff] %vm292_vm2, %v1547_v16 }
 0xb54   :  { %2112 = shalt.err (!%p2109_p3)
}
 0xb55   :  { %1558 = dma.vmem_to_hbm [thread:$0]  %s1556_s29, 128, %s2522_s20, [#allocation4]  }
 0xb56   :  { %2133 = dma.done.wait [#allocation4], 128  }
 0xb57   :  { %2134 = vsyncadd [#allocation4], 4294967168 }
 0xb58   :  { %2135 = dma.done.wait [#allocation21], 128  }
 0xb59   :  { %2136 = vsyncadd [#allocation21], 4294967168 }
 0xb5a   :  { %1575 = vsyncpa [#allocation3], 1 }
 0xb5b   :  { %1576 = vsyncpa [#allocation6], 1 }
 0xb5c   :  { %1577 = vsyncpa [#allocation9], 1 }
 0xb5d   :  { %1578 = vsyncpa [#allocation12], 1 }
 0xb5e   :  { %1579 = vsyncpa [#allocation15], 1 }
 0xb5f   :  { %1580 = vsyncpa [#allocation18], 1 }
 0xb60   :  { %1581 = vsyncpa [#allocation4], 1 }
 0xb61   :  { %1582 = vsyncpa [#allocation21], 1 }

</bundles_post_ra>
